<compile_context>
chip_gen: v5e
topology: v5e:2x2
jax: 0.10.0
libtpu: 0.0.40
codegen_flags: <defaults>
</compile_context>

<pallas_src>
import jax
import jax.numpy as jnp
from jax.experimental import pallas as pl
from jax.experimental.pallas import tpu as pltpu

NEG_SLOPE = 0.01      # torch.nn.functional.leaky_relu default negative_slope
LANE = 128
SUBLANE = 8


def _leaky_relu(x):
    # Exactly equivalent to leaky_relu for 0 < slope < 1.
    return jnp.maximum(x, NEG_SLOPE * x)


def _round_up(n, m):
    return ((n + m - 1) // m) * m


def _choose_tiling(batch_p, tile_b_max):
    """Pick (tile_b, num_steps).

    tile_b is a sublane multiple; the padded batch (num_steps * tile_b)
    overshoots batch_p by at most num_steps * SUBLANE rows (<10% waste once
    the batch is big enough to split). For batch_p >= 256 we force >=2 grid
    steps so both v7x TensorCores are engaged and the DMA pipeline has
    something to overlap; tiny inference batches stay as a single step.
    """
    steps = pl.cdiv(batch_p, tile_b_max)
    if steps == 1 and batch_p >= 256:
        steps = 2
    tile_b = _round_up(pl.cdiv(batch_p, steps), SUBLANE)
    steps = pl.cdiv(batch_p, tile_b)
    return tile_b, steps


def ffnn_kernel(x_ref, w1_ref, b1_ref, w2_ref, b2_ref, w3_ref, b3_ref, o_ref):
    # One (tile_b, obs) f32 activation tile per grid step. Weights/biases use
    # constant block indices so they are DMA'd once and stay VMEM-resident.
    # MXU: bf16 x bf16 -> f32 accumulation; f32 VPU epilogue.
    x = x_ref[...].astype(jnp.bfloat16)
    h = jnp.dot(x, w1_ref[...], preferred_element_type=jnp.float32)
    h = _leaky_relu(h + b1_ref[...])
    h = jnp.dot(h.astype(jnp.bfloat16), w2_ref[...],
                preferred_element_type=jnp.float32)
    h = _leaky_relu(h + b2_ref[...])
    out = jnp.dot(h.astype(jnp.bfloat16), w3_ref[...],
                  preferred_element_type=jnp.float32)
    o_ref[...] = (out + b3_ref[...]).astype(o_ref.dtype)


def simple_ffnn_forward(s, padded_params, *, tile_b_max=2048):
    """Pallas forward pass.

    s: (batch, obs) or (obs,) float32.
    padded_params: output of pad_params() (hidden dim lane-padded, bf16 weights;
                   input/output feature dims unpadded).
    Returns (batch, n_actions) float32 Q-values.
    """
    if s.ndim == 1:
        s = s.reshape(1, -1)
    s = s.astype(jnp.float32)
    w1, b1, w2, b2, w3, b3 = padded_params
    batch, obs = s.shape
    hid_p = w1.shape[1]
    n_actions = w3.shape[1]

    batch_p = _round_up(batch, SUBLANE)
    tile_b, steps = _choose_tiling(batch_p, tile_b_max)
    rows = tile_b * steps                      # total padded rows (small overshoot)

    x = s if rows == batch else jnp.pad(s, ((0, rows - batch), (0, 0)))

    const2d = lambda shp: pl.BlockSpec(shp, lambda i: (0, 0))  # VMEM-resident

    flops = 2 * rows * (obs * hid_p + hid_p * hid_p + hid_p * n_actions)
    bytes_accessed = (rows * obs * 4 + rows * n_actions * 4
                      + (w1.size + w2.size + w3.size) * 2
                      + (b1.size + b2.size + b3.size) * 4)

    out = pl.pallas_call(
        ffnn_kernel,
        out_shape=jax.ShapeDtypeStruct((rows, n_actions), jnp.float32),
        grid=(steps,),
        in_specs=[
            pl.BlockSpec((tile_b, obs), lambda i: (i, 0)),  # activations (f32)
            const2d((obs, hid_p)),                          # W1 (bf16)
            const2d((1, hid_p)),                            # b1 (f32)
            const2d((hid_p, hid_p)),                        # W2 (bf16)
            const2d((1, hid_p)),                            # b2 (f32)
            const2d((hid_p, n_actions)),                    # W3 (bf16, narrow)
            const2d((1, n_actions)),                        # b3 (f32, narrow)
        ],
        out_specs=pl.BlockSpec((tile_b, n_actions), lambda i: (i, 0)),
        compiler_params=pltpu.CompilerParams(
            dimension_semantics=("parallel",)),             # v7x: 2 TCs
        cost_estimate=pl.CostEstimate(flops=int(flops), transcendentals=0,
                                      bytes_accessed=int(bytes_accessed)),
    )(x, w1, b1, w2, b2, w3, b3)

    # Narrow output: only a tiny row-slice remains (skipped when batch was not
    # padded); the old 32x-inflated column slice round trip is gone.
    return out if rows == batch else out[:batch]


def init_params(key, obs_size, n_actions):
    """Deterministic init mimicking torch.nn.Linear (uniform +/- 1/sqrt(fan_in)).

    Weights are returned already transposed to (in, out); unpadded f32.
    """
    hidden = 2 * obs_size
    dims = [(obs_size, hidden), (hidden, hidden), (hidden, n_actions)]
    params = []
    for fan_in, fan_out in dims:
        key, kw, kb = jax.random.split(key, 3)
        bound = 1.0 / jnp.sqrt(float(fan_in))
        w = jax.random.uniform(kw, (fan_in, fan_out), jnp.float32, -bound, bound)
        b = jax.random.uniform(kb, (1, fan_out), jnp.float32, -bound, bound)
        params += [w, b]
    return tuple(params)


def pad_params(params):
    """Pad only the hidden dim to a lane multiple (128); weights -> bf16.

    Input (obs) and output (n_actions) feature dims stay unpadded so the
    kernel's HBM streams carry no dead bytes. Zero padding of the hidden dim is
    exact: padded hidden units are identically zero through the leaky_relu and
    multiply zero weight rows/columns downstream. Done once, outside the
    per-call path.
    """
    w1, b1, w2, b2, w3, b3 = params
    hid = w1.shape[1]
    hid_p = _round_up(hid, LANE)

    def pad_w(w, out_i, out_o):
        i, o = w.shape
        return jnp.pad(w, ((0, out_i - i), (0, out_o - o))).astype(jnp.bfloat16)

    w1p = pad_w(w1, w1.shape[0], hid_p)   # (obs, hid_p)
    w2p = pad_w(w2, hid_p, hid_p)         # (hid_p, hid_p)
    w3p = pad_w(w3, hid_p, w3.shape[1])   # (hid_p, n_actions)
    b1p = jnp.pad(b1, ((0, 0), (0, hid_p - hid)))   # f32
    b2p = jnp.pad(b2, ((0, 0), (0, hid_p - hid)))   # f32
    b3p = b3                                        # f32, unpadded
    return (w1p, b1p, w2p, b2p, w3p, b3p)


def reference_forward_bf16(s, padded_params):
    """Reference with the same bf16-operand / f32-accumulate math as the kernel."""
    if s.ndim == 1:
        s = s.reshape(1, -1)
    w1, b1, w2, b2, w3, b3 = padded_params
    x = s.astype(jnp.bfloat16)
    h = _leaky_relu(jnp.dot(x, w1, preferred_element_type=jnp.float32) + b1)
    h = _leaky_relu(jnp.dot(h.astype(jnp.bfloat16), w2,
                            preferred_element_type=jnp.float32) + b2)
    return jnp.dot(h.astype(jnp.bfloat16), w3,
                   preferred_element_type=jnp.float32) + b3


def reference_forward_f32(s, params):
    """Full-f32 PyTorch-equivalent forward (unpadded params)."""
    if s.ndim == 1:
        s = s.reshape(1, -1)
    w1, b1, w2, b2, w3, b3 = params
    h = _leaky_relu(s @ w1 + b1)
    h = _leaky_relu(h @ w2 + b2)
    return h @ w3 + b3


if __name__ == "__main__":
    key = jax.random.PRNGKey(0)
    obs_size = 16      # observation_space.shape[0]
    n_actions = 4      # action_space.n

    kparam, kx1, kx2 = jax.random.split(key, 3)
    params_f32 = init_params(kparam, obs_size, n_actions)
    params = pad_params(params_f32)

    # Case 1: small inference batch (single grid step, q-learner act() path).
    x_small = jax.random.normal(kx1, (8, obs_size), jnp.float32)
    # Case 2: larger replay batch (>=2 grid steps, ragged batch padding path).
    x_big = jax.random.normal(kx2, (300, obs_size), jnp.float32)

    for x in (x_small, x_big):
        out = jax.block_until_ready(simple_ffnn_forward(x, params))
        assert out.shape == (x.shape[0], n_actions)

        # Tight check vs a reference using identical bf16-operand math.
        ref_bf16 = reference_forward_bf16(x, params)
        assert jnp.allclose(out, ref_bf16, atol=2e-3, rtol=2e-3), \
            "mismatch vs bf16 reference"
        # Greedy-action agreement vs the same-math reference (Q-learner use).
        assert bool(jnp.all(jnp.argmax(out, -1) == jnp.argmax(ref_bf16, -1))), \
            "argmax mismatch vs bf16 reference"

        # Semantics check vs full-f32 PyTorch-equivalent forward (loose: bf16 ops).
        ref_f32 = reference_forward_f32(x, params_f32)
        assert jnp.allclose(out, ref_f32, atol=5e-2, rtol=5e-2), \
            "mismatch vs f32 reference"

    # 1-D observation path (matches PyTorch reshape(1, -1) behavior).
    out1d = jax.block_until_ready(simple_ffnn_forward(x_small[0], params))
    assert out1d.shape == (1, n_actions)

    print("KERNEL_OK")
</pallas_src>

<mosaic_0001>
module attributes {stable_mosaic.version = 11 : i64} {
  func.func @ffnn_kernel(%arg0: i32, %arg1: memref<8x16xf32, #tpu.memory_space<vmem>>, %arg2: memref<16x128xbf16, #tpu.memory_space<vmem>>, %arg3: memref<1x128xf32, #tpu.memory_space<vmem>>, %arg4: memref<128x128xbf16, #tpu.memory_space<vmem>>, %arg5: memref<1x128xf32, #tpu.memory_space<vmem>>, %arg6: memref<128x4xbf16, #tpu.memory_space<vmem>>, %arg7: memref<1x4xf32, #tpu.memory_space<vmem>>, %arg8: memref<8x4xf32, #tpu.memory_space<vmem>>) attributes {dimension_semantics = [#tpu.dimension_semantics<parallel>], iteration_bounds = array<i64: 1>, scalar_prefetch = 0 : i64, scratch_operands = 0 : i64, tpu.core_type = #tpu.core_type<tc>, window_params = [{transform_indices = @transform_0, window_bounds = array<i64: 8, 16>}, {pipeline_mode = #tpu.pipeline_mode<synchronous>, transform_indices = @transform_1, window_bounds = array<i64: 16, 128>}, {pipeline_mode = #tpu.pipeline_mode<synchronous>, transform_indices = @transform_2, window_bounds = array<i64: 1, 128>}, {pipeline_mode = #tpu.pipeline_mode<synchronous>, transform_indices = @transform_3, window_bounds = array<i64: 128, 128>}, {pipeline_mode = #tpu.pipeline_mode<synchronous>, transform_indices = @transform_4, window_bounds = array<i64: 1, 128>}, {pipeline_mode = #tpu.pipeline_mode<synchronous>, transform_indices = @transform_5, window_bounds = array<i64: 128, 4>}, {pipeline_mode = #tpu.pipeline_mode<synchronous>, transform_indices = @transform_6, window_bounds = array<i64: 1, 4>}, {transform_indices = @transform_7, window_bounds = array<i64: 8, 4>}]} {
    %c0 = arith.constant 0 : index
    %c0_0 = arith.constant 0 : index
    %0 = vector.load %arg1[%c0, %c0_0] : memref<8x16xf32, #tpu.memory_space<vmem>>, vector<8x16xf32>
    %1 = arith.truncf %0 : vector<8x16xf32> to vector<8x16xbf16>
    %c0_1 = arith.constant 0 : index
    %c0_2 = arith.constant 0 : index
    %2 = vector.load %arg2[%c0_1, %c0_2] : memref<16x128xbf16, #tpu.memory_space<vmem>>, vector<16x128xbf16>
    %cst = arith.constant dense<0.000000e+00> : vector<8x128xf32>
    %3 = tpu.matmul %1, %2, %cst {dimension_numbers = #tpu.dot_dimension_numbers<[1], [0], [0], [1], [0, 0, 1, 1], [], []>} : vector<8x16xbf16>, vector<16x128xbf16>, vector<8x128xf32> -> vector<8x128xf32>
    %c0_3 = arith.constant 0 : index
    %c0_4 = arith.constant 0 : index
    %4 = vector.load %arg3[%c0_3, %c0_4] : memref<1x128xf32, #tpu.memory_space<vmem>>, vector<1x128xf32>
    %5 = vector.broadcast %4 : vector<1x128xf32> to vector<8x128xf32>
    %6 = arith.addf %3, %5 : vector<8x128xf32>
    %cst_5 = arith.constant 0.00999999977 : f32
    %7 = vector.broadcast %cst_5 : f32 to vector<8x128xf32>
    %8 = arith.mulf %7, %6 : vector<8x128xf32>
    %9 = arith.maximumf %6, %8 : vector<8x128xf32>
    %10 = arith.truncf %9 : vector<8x128xf32> to vector<8x128xbf16>
    %c0_6 = arith.constant 0 : index
    %c0_7 = arith.constant 0 : index
    %11 = vector.load %arg4[%c0_6, %c0_7] : memref<128x128xbf16, #tpu.memory_space<vmem>>, vector<128x128xbf16>
    %cst_8 = arith.constant dense<0.000000e+00> : vector<8x128xf32>
    %12 = tpu.matmul %10, %11, %cst_8 {dimension_numbers = #tpu.dot_dimension_numbers<[1], [0], [0], [1], [0, 0, 1, 1], [], []>} : vector<8x128xbf16>, vector<128x128xbf16>, vector<8x128xf32> -> vector<8x128xf32>
    %c0_9 = arith.constant 0 : index
    %c0_10 = arith.constant 0 : index
    %13 = vector.load %arg5[%c0_9, %c0_10] : memref<1x128xf32, #tpu.memory_space<vmem>>, vector<1x128xf32>
    %14 = vector.broadcast %13 : vector<1x128xf32> to vector<8x128xf32>
    %15 = arith.addf %12, %14 : vector<8x128xf32>
    %cst_11 = arith.constant 0.00999999977 : f32
    %16 = vector.broadcast %cst_11 : f32 to vector<8x128xf32>
    %17 = arith.mulf %16, %15 : vector<8x128xf32>
    %18 = arith.maximumf %15, %17 : vector<8x128xf32>
    %19 = arith.truncf %18 : vector<8x128xf32> to vector<8x128xbf16>
    %c0_12 = arith.constant 0 : index
    %c0_13 = arith.constant 0 : index
    %20 = vector.load %arg6[%c0_12, %c0_13] : memref<128x4xbf16, #tpu.memory_space<vmem>>, vector<128x4xbf16>
    %cst_14 = arith.constant dense<0.000000e+00> : vector<8x4xf32>
    %21 = tpu.matmul %19, %20, %cst_14 {dimension_numbers = #tpu.dot_dimension_numbers<[1], [0], [0], [1], [0, 0, 1, 1], [], []>} : vector<8x128xbf16>, vector<128x4xbf16>, vector<8x4xf32> -> vector<8x4xf32>
    %c0_15 = arith.constant 0 : index
    %c0_16 = arith.constant 0 : index
    %22 = vector.load %arg7[%c0_15, %c0_16] : memref<1x4xf32, #tpu.memory_space<vmem>>, vector<1x4xf32>
    %23 = vector.broadcast %22 : vector<1x4xf32> to vector<8x4xf32>
    %24 = arith.addf %21, %23 : vector<8x4xf32>
    %c0_17 = arith.constant 0 : index
    %c0_18 = arith.constant 0 : index
    %25 = vector.load %arg8[%c0_17, %c0_18] : memref<8x4xf32, #tpu.memory_space<vmem>>, vector<8x4xf32>
    tpu.vector_store %arg8[%c0_17, %c0_18], %24 {strides = array<i32>} : memref<8x4xf32, #tpu.memory_space<vmem>>, vector<8x4xf32>,
    return
  }
  func.func @transform_0(%arg0: i32) -> (i32, i32) {
    %c0_i32 = arith.constant 0 : i32
    %c0_i32_0 = arith.constant 0 : i32
    return %arg0, %c0_i32 : i32, i32
  }
  func.func @transform_1(%arg0: i32) -> (i32, i32) {
    %c0_i32 = arith.constant 0 : i32
    %c0_i32_0 = arith.constant 0 : i32
    %c0_i32_1 = arith.constant 0 : i32
    return %c0_i32, %c0_i32_0 : i32, i32
  }
  func.func @transform_2(%arg0: i32) -> (i32, i32) {
    %c0_i32 = arith.constant 0 : i32
    %c0_i32_0 = arith.constant 0 : i32
    %c0_i32_1 = arith.constant 0 : i32
    return %c0_i32, %c0_i32_0 : i32, i32
  }
  func.func @transform_3(%arg0: i32) -> (i32, i32) {
    %c0_i32 = arith.constant 0 : i32
    %c0_i32_0 = arith.constant 0 : i32
    %c0_i32_1 = arith.constant 0 : i32
    return %c0_i32, %c0_i32_0 : i32, i32
  }
  func.func @transform_4(%arg0: i32) -> (i32, i32) {
    %c0_i32 = arith.constant 0 : i32
    %c0_i32_0 = arith.constant 0 : i32
    %c0_i32_1 = arith.constant 0 : i32
    return %c0_i32, %c0_i32_0 : i32, i32
  }
  func.func @transform_5(%arg0: i32) -> (i32, i32) {
    %c0_i32 = arith.constant 0 : i32
    %c0_i32_0 = arith.constant 0 : i32
    %c0_i32_1 = arith.constant 0 : i32
    return %c0_i32, %c0_i32_0 : i32, i32
  }
  func.func @transform_6(%arg0: i32) -> (i32, i32) {
    %c0_i32 = arith.constant 0 : i32
    %c0_i32_0 = arith.constant 0 : i32
    %c0_i32_1 = arith.constant 0 : i32
    return %c0_i32, %c0_i32_0 : i32, i32
  }
  func.func @transform_7(%arg0: i32) -> (i32, i32) {
    %c0_i32 = arith.constant 0 : i32
    %c0_i32_0 = arith.constant 0 : i32
    return %arg0, %c0_i32 : i32, i32
  }
}

</mosaic_0001>

<bundles_post_ra>
// kernel: tpu_custom_call.1
= control target key start
LH: loop header
LB: loop body
LE: loop exit
PB: predicated region body
PF: predicated region fallthrough
CT: control target
= control target key end

     0   :  { %12 = vsyncpa [#allocation3], 0  ;;  %s519_s0 = inlined_call_operand.hbm [shape: f32[8,16], index: 0, kind: input, shape index: {}]   ;;  %s520_s1 = inlined_call_operand.hbm [shape: bf16[16,128], index: 1, kind: input, shape index: {}]   ;;  %s521_s2 = inlined_call_operand.vmem [shape: f32[1,128], index: 2, kind: input, shape index: {}]   ;;  %s522_s3 = inlined_call_operand.vmem [shape: bf16[128,128], index: 3, kind: input, shape index: {}]   ;;  %s523_s4 = inlined_call_operand.vmem [shape: f32[1,128], index: 4, kind: input, shape index: {}]   ;;  %s524_s5 = inlined_call_operand.vmem [shape: bf16[128,4], index: 5, kind: input, shape index: {}]   ;;  %s525_s6 = inlined_call_operand.vmem [shape: f32[1,4], index: 6, kind: input, shape index: {}]   ;;  %s526_s7 = inlined_call_operand.vmem [shape: f32[8,4], index: 7, kind: output, shape index: {}]  }
   0x1   :  { %s19_s26 = sshll.u32 %s519_s0, 4  ;;  %s20_s26 = int_to_ptr.hbm [resolvable:$true] %s19_s26 }
   0x2   :  { %13 = vsyncpa [#allocation5], 0  ;;  %s409_s27 = smov [#allocation2]   ;;  %s29_s8 = sshll.u32 %s520_s1, 4  ;;  %s30_s8 = int_to_ptr.hbm [resolvable:$true] %s29_s8 }
   0x3   :  { %s21_s28 = sshll.u32 %s409_s27, 4  ;;  %s410_s9 = smov [#allocation4]   ;;  %s22_s28 = int_to_ptr.vmem [resolvable:$true] %s21_s28 }
   0x4   :  { %24 = dma.hbm_to_vmem [thread:$0]  %s20_s26, 128, %s22_s28, [#allocation3]  }
   0x5   :  { %s31_s10 = sshll.u32 %s410_s9, 4  ;;  %s411_s11 = smov 64   ;;  %s32_s10 = int_to_ptr.vmem [resolvable:$true] %s31_s10 }
   0x6   :  { %s412_s12 = smov 4  }
   0x7   :  { %37 = dma.hbm_to_vmem [thread:$0]  %s30_s8, 128, %s32_s10, [#allocation5], %s411_s11, %s411_s11, %s412_s12  }
   0x8   :  { %405 = dma.done.wait [#allocation3], 128  }
   0x9   :  { %406 = vsyncadd [#allocation3], 4294967168 }
   0xa   :  { %407 = dma.done.wait [#allocation5], 128  }
   0xb   :  { %408 = vsyncadd [#allocation5], 4294967168  ;;  %v333_v0 = vld [vmem:[#allocation4] sm:$0xff]  ;;  %v57_v1 = vld [vmem:[#allocation2] sm:$0xff]  ;;  %vm71_vm0 = vcmask 130048   ;;  %vm256_vm1 = vcmask 31744  }
   0xc   :  { %v341_v2 = vld [vmem:[%s522_s3 + $0x38] sm:$0xff]  ;;  %v58_v3 = vpack.c.bf16 %v57_v1, %v57_v1  ;;  %82 = vmatpush.bf16.msra.mxu0 %v333_v0  ;;  %v340_v4 = vld [vmem:[%s522_s3 + $0x30] sm:$0xff]  ;;  %v339_v5 = vld [vmem:[%s522_s3 + $0x28] sm:$0xff] }
   0xd   :  { %159 = vmatpush.bf16.msra.mxu1 %v341_v2  ;;  %v338_v6 = vld [vmem:[%s522_s3 + $0x20] sm:$0xff]  ;;  %v337_v7 = vld [vmem:[%s522_s3 + $0x18] sm:$0xff]  ;;  %v336_v8 = vld [vmem:[%s522_s3 + $0x10] sm:$0xff] }
   0xe   :  { %v335_v9 = vld [vmem:[%s522_s3 + $0x8] sm:$0xff]  ;;  %v334_v10 = vld [vmem:[%s522_s3] sm:$0xff]  ;;  %v349_v11 = vld [vmem:[%s524_s5 + $0x38] sm:$0xff] }
   0xf   :  { %268 = vmatmul.msk.bf16.vlgmr.msra.gmra.mxu0 %vm71_vm0, %v58_v3  ;;  %243 = vmatpush.bf16.msra.mxu2 %v349_v11  ;;  %v348_v12 = vld [vmem:[%s524_s5 + $0x30] sm:$0xff]  ;;  %v347_v13 = vld [vmem:[%s524_s5 + $0x28] sm:$0xff]  ;;  %v346_v14 = vld [vmem:[%s524_s5 + $0x20] sm:$0xff] }
  0x10   :  { %v345_v15 = vld [vmem:[%s524_s5 + $0x18] sm:$0xff]  ;;  %v344_v16 = vld [vmem:[%s524_s5 + $0x10] sm:$0xff]  ;;  %v354_v17 = vld [vmem:[%s521_s2] ss:$0 sm:$0xff] }
  0x11   :  { %160 = vmatpush.bf16.msra.mxu1 %v340_v4  ;;  %v343_v24 = vld [vmem:[%s524_s5 + $0x8] sm:$0xff]  ;;  %v342_v25 = vld [vmem:[%s524_s5] sm:$0xff] }
  0x12   :  { %v355_v26 = vld [vmem:[%s523_s4] ss:$0 sm:$0xff] }
  0x13   :  { %244 = vmatpush.bf16.msra.mxu2 %v348_v12  ;;  %v356_v33 = vld [vmem:[%s525_s6] ss:$0 sm:$0xff] }
  0x15   :  { %161 = vmatpush.bf16.msra.mxu1 %v339_v5 }
  0x17   :  { %245 = vmatpush.bf16.msra.mxu2 %v347_v13 }
  0x19   :  { %162 = vmatpush.bf16.msra.mxu1 %v338_v6 }
  0x1b   :  { %246 = vmatpush.bf16.msra.mxu2 %v346_v14 }
  0x1d   :  { %163 = vmatpush.bf16.msra.mxu1 %v337_v7 }
  0x1f   :  { %247 = vmatpush.bf16.msra.mxu2 %v345_v15 }
  0x21   :  { %164 = vmatpush.bf16.msra.mxu1 %v336_v8 }
  0x23   :  { %248 = vmatpush.bf16.msra.mxu2 %v344_v16 }
  0x25   :  { %165 = vmatpush.bf16.msra.mxu1 %v335_v9 }
  0x27   :  { %249 = vmatpush.bf16.msra.mxu2 %v343_v24 }
  0x29   :  { %166 = vmatpush.bf16.msra.mxu1 %v334_v10 }
  0x2b   :  { %250 = vmatpush.bf16.msra.mxu2 %v342_v25 }
  0x8c   :  { %v84_v18 = vpop.f32.mrf.mxu0 }
  0x8d   :  { %v85_v19 = vadd.f32 %v354_v17, %v84_v18 }
  0x8f   :  { %v88_v20 = vmul.f32 0.01, %v85_v19 }
  0x91   :  { %v89_v21 = vmax.f32 %v85_v19, %v88_v20 }
  0x93   :  { %v90_v22 = vpack.c.bf16 %v89_v21, %v89_v21 }
  0x94   :  { %v86_v23 = vpop.f32.mrf.mxu0 }
  0x95   :  { %167 = vmatmul.bf16.vlgmr.msra.gmra.mxu1 %v90_v22 }
 0x112   :  { %v168_v27 = vpop.f32.mrf.mxu1 }
 0x113   :  { %v169_v28 = vadd.f32 %v355_v26, %v168_v27 }
 0x115   :  { %v172_v29 = vmul.f32 0.01, %v169_v28 }
 0x117   :  { %v173_v30 = vmax.f32 %v169_v28, %v172_v29 }
 0x119   :  { %v174_v31 = vpack.c.bf16 %v173_v30, %v173_v30 }
 0x11a   :  { %v170_v32 = vpop.f32.mrf.mxu1 }
 0x11b   :  { %251 = vmatmul.bf16.vlgmr.msra.gmra.mxu2 %v174_v31 }
 0x19e   :  { %v252_v34 = vpop.f32.mrf.mxu2 }
 0x19f   :  { %v253_v35 = vadd.f32 %v356_v33, %v252_v34 }
 0x1a1   :  { %257 = vst.msk [vmem:[%s526_s7] sm:$0xff] %vm256_vm1, %v253_v35 }
 0x1a6   :  { %v254_v36 = vpop.f32.mrf.mxu2 }
 0x1a7   :  { %262 = vsyncpa [#allocation3], 1 }
 0x1a8   :  { %263 = vsyncpa [#allocation5], 1 }

</bundles_post_ra>
